<compile_context>
chip_gen: v7x
topology: tpu7x:2x2x1
jax: 0.10.0
libtpu: 0.0.40
codegen_flags: <defaults>
</compile_context>

<pallas_src>
import jax
import jax.numpy as jnp
from jax.experimental import pallas as pl
from jax.experimental.pallas import tpu as pltpu

C = 512
OUT_NEURONS = 2
BN_EPS = 1e-5


def _round_up(a, b):
    return (a + b - 1) // b * b


def _vmem_budgets():
    """(per-x-tile byte budget, vmem_limit_bytes), derived per TPU generation."""
    try:
        vmem_bytes = pltpu.get_tpu_info().vmem_capacity_bytes
    except Exception:
        vmem_bytes = 64 * 1024 * 1024            # conservative: v7x per-TC VMEM
    if vmem_bytes >= 100 * 1024 * 1024:          # v5e / v6e: 128 MiB VMEM
        return 16 * 1024 * 1024, 96 * 1024 * 1024
    return 8 * 1024 * 1024, 48 * 1024 * 1024     # v7x: 64 MiB VMEM


def _pick_tile_n(n):
    """Batch tile: multiple of 8 (or the full dim), capped at 128. For n > 8 we
    aim for >=2 batch blocks so the 'parallel' axis feeds both v7x TensorCores."""
    if n <= 8:
        return n                                  # full-dim block (grid_n == 1)
    return min(128, _round_up(pl.cdiv(n, 2), 8))


def _pick_tile_k(k_total, budget_elems):
    """Largest multiple of 128 dividing k_total that fits the x-tile byte budget.
    Collapses the K grid axis to a single step whenever a whole row fits."""
    if k_total <= budget_elems:
        return k_total
    m = max(1, budget_elems // 128)
    while m > 1 and k_total % (128 * m) != 0:
        m -= 1
    return 128 * m


def gender_head_kernel(x_ref, w_ref, o_ref, acc_ref):
    """acc(tile_n,2) += x(tile_n,tile_k) @ W_k(2,tile_k).T, f32 accumulate.

    w_ref is the full folded weight (grid_k, 2, tile_k), VMEM-resident
    (constant index_map) -> only x is DMA'd in the steady state.
    """
    k = pl.program_id(1)

    @pl.when(k == 0)
    def _init():
        acc_ref[...] = jnp.zeros_like(acc_ref)

    w_blk = w_ref[k]                                   # (2, tile_k), resident VMEM
    acc_ref[...] += jax.lax.dot_general(
        x_ref[...], w_blk,
        dimension_numbers=(((1,), (1,)), ((), ())),    # x @ w_blk.T -> (tile_n, 2)
        preferred_element_type=jnp.float32)

    # Single (masked, tiny) output store per batch block, outside the hot loop.
    @pl.when(k == pl.num_programs(1) - 1)
    def _finalize():
        o_ref[...] = acc_ref[...].astype(o_ref.dtype)


def gender_detect_forward(x_nchw, gamma, beta, running_mean, running_var, w, b,
                          x_tile_budget_bytes=None):
    """x_nchw: (N, 512, H, W). Returns (N, 2) float32 (eval-mode BatchNorm)."""
    n, c, h, w_sp = x_nchw.shape
    assert c == C, f"expected {C} channels, got {c}"
    hw = h * w_sp
    k_total = c * hw

    # ---- fold BN (running stats) + 1/HW pooling into the linear layer (host, f32) ----
    gamma32 = gamma.astype(jnp.float32)
    beta32 = beta.astype(jnp.float32)
    mean32 = running_mean.astype(jnp.float32)
    var32 = running_var.astype(jnp.float32)
    w32 = w.astype(jnp.float32)                        # (2, 512)
    b32 = b.astype(jnp.float32)                        # (2,)

    scale = gamma32 / jnp.sqrt(var32 + BN_EPS)         # (C,)
    shift = beta32 - mean32 * scale                    # (C,)

    w_fold_t = w32 * scale[None, :] * (1.0 / hw)       # (2, C): BN scale + pool factor
    b_fold = shift @ w32.T + b32                       # (2,):   BN shift through linear

    # Replicate each channel's folded weight across its HW positions -> (2, C*HW),
    # matching x.reshape(N, C*HW) (index = c*HW + spatial).
    w_big = jnp.repeat(w_fold_t, hw, axis=1)           # (2, C*HW)

    # Keep x in its native dtype (bf16 halves HBM traffic); MXU accumulates in f32.
    x2d = x_nchw.reshape(n, k_total)
    # TODO(synk): for bf16 x this adds one bf16 quantization of the folded weights;
    # keep W in f32 (and accept the mixed-precision dot) if that matters.
    w_big = w_big.astype(x2d.dtype)
    itemsize = x2d.dtype.itemsize

    # ---- tiling: batch (parallel) x contraction (arbitrary), per-generation VMEM budget ----
    x_tile_budget, vmem_limit = _vmem_budgets()
    if x_tile_budget_bytes is not None:                # test hook
        x_tile_budget = x_tile_budget_bytes

    tile_n = _pick_tile_n(n)
    budget_elems = max(128, x_tile_budget // (tile_n * itemsize))
    tile_k = _pick_tile_k(k_total, budget_elems)
    grid_k = k_total // tile_k
    grid = (pl.cdiv(n, tile_n), grid_k)                # ragged batch: no host-side pad copy

    # Lane-dense resident weight layout: block k -> (2, tile_k) slab.
    w_blocks = w_big.reshape(OUT_NEURONS, grid_k, tile_k).transpose(1, 0, 2)

    cost = pl.CostEstimate(
        flops=2 * n * k_total * OUT_NEURONS,
        transcendentals=0,
        bytes_accessed=(n * k_total * itemsize                 # x (dominant stream)
                        + OUT_NEURONS * k_total * itemsize     # folded weight (once)
                        + n * OUT_NEURONS * 4),                # output
    )

    out = pl.pallas_call(
        gender_head_kernel,
        out_shape=jax.ShapeDtypeStruct((n, OUT_NEURONS), jnp.float32),
        grid_spec=pltpu.PrefetchScalarGridSpec(
            num_scalar_prefetch=0,
            grid=grid,
            in_specs=[
                # x: streamed, large lane-dense blocks, default double-buffering.
                pl.BlockSpec((tile_n, tile_k), lambda i, k: (i, k)),
                # folded W: constant index_map -> fetched once, VMEM-resident.
                pl.BlockSpec((grid_k, OUT_NEURONS, tile_k), lambda i, k: (0, 0, 0)),
            ],
            out_specs=pl.BlockSpec((tile_n, OUT_NEURONS), lambda i, k: (i, 0)),
            scratch_shapes=[pltpu.VMEM((tile_n, OUT_NEURONS), jnp.float32)],
        ),
        compiler_params=pltpu.CompilerParams(
            dimension_semantics=("parallel", "arbitrary"),  # batch shards across v7x's 2 TCs
            vmem_limit_bytes=vmem_limit,
        ),
        cost_estimate=cost,
    )(x2d, w_blocks)

    return out + b_fold[None, :]                       # bias folded on host (tiny (N,2) add)


def reference_forward(x_nchw, gamma, beta, running_mean, running_var, w, b):
    """Pure-JAX reference with identical (eval-mode) semantics."""
    inv_std = 1.0 / jnp.sqrt(running_var + BN_EPS)
    bn = (x_nchw - running_mean[None, :, None, None]) * inv_std[None, :, None, None]
    bn = bn * gamma[None, :, None, None] + beta[None, :, None, None]
    pooled = bn.mean(axis=(2, 3))                      # (N, 512)
    return pooled @ w.T + b[None, :]                   # (N, 2)


if __name__ == "__main__":
    key = jax.random.PRNGKey(0)
    k_g, k_b, k_m, k_v, k_w, k_bias = jax.random.split(key, 6)

    gamma = 1.0 + 0.1 * jax.random.normal(k_g, (C,), dtype=jnp.float32)
    beta = 0.1 * jax.random.normal(k_b, (C,), dtype=jnp.float32)
    running_mean = 0.1 * jax.random.normal(k_m, (C,), dtype=jnp.float32)
    running_var = jnp.abs(jax.random.normal(k_v, (C,), dtype=jnp.float32)) + 0.5
    w = jax.random.normal(k_w, (OUT_NEURONS, C), dtype=jnp.float32) * (1.0 / jnp.sqrt(C))
    b = 0.01 * jax.random.normal(k_bias, (OUT_NEURONS,), dtype=jnp.float32)

    def check(n, h, w_sp, budget=None):
        kx = jax.random.PRNGKey(1000 * n + h)
        x = jax.random.normal(kx, (n, C, h, w_sp), dtype=jnp.float32)
        out = jax.block_until_ready(
            gender_detect_forward(x, gamma, beta, running_mean, running_var, w, b,
                                  x_tile_budget_bytes=budget))
        ref = reference_forward(x, gamma, beta, running_mean, running_var, w, b)
        assert out.shape == (n, OUT_NEURONS), out.shape
        assert jnp.allclose(out, ref, atol=2e-4, rtol=2e-4), (out, ref)

    check(2, 4, 4)                       # single K block, single batch block
    check(9, 2, 2)                       # ragged batch: 2 batch blocks, partial last block
    check(4, 4, 4, budget=64 * 1024)     # forced small budget -> multi-step K accumulation

    print("KERNEL_OK")
</pallas_src>

<mosaic_0001>
module attributes {stable_mosaic.version = 11 : i64} {
  func.func @gender_head_kernel(%arg0: i32, %arg1: i32, %arg2: memref<2x8192xf32, #tpu.memory_space<vmem>>, %arg3: memref<1x2x8192xf32, #tpu.memory_space<vmem>>, %arg4: memref<2x2xf32, #tpu.memory_space<vmem>>, %arg5: memref<2x2xf32, #tpu.memory_space<vmem>>) attributes {dimension_semantics = [#tpu.dimension_semantics<parallel>, #tpu.dimension_semantics<arbitrary>], iteration_bounds = array<i64: 1, 1>, scalar_prefetch = 0 : i64, scratch_operands = 1 : i64, tpu.core_type = #tpu.core_type<tc>, window_params = [{transform_indices = @transform_0, window_bounds = array<i64: 2, 8192>}, {pipeline_mode = #tpu.pipeline_mode<synchronous>, transform_indices = @transform_1, window_bounds = array<i64: 1, 2, 8192>}, {transform_indices = @transform_2, window_bounds = array<i64: 2, 2>}]} {
    %c0_i32 = arith.constant 0 : i32
    %0 = arith.cmpi eq, %arg1, %c0_i32 : i32
    %1 = arith.extui %0 : i1 to i32
    %c0_i32_0 = arith.constant 0 : i32
    %2 = arith.cmpi ne, %1, %c0_i32_0 : i32
    scf.if %2 {
      %cst_10 = arith.constant 0.000000e+00 : f32
      %14 = vector.broadcast %cst_10 : f32 to vector<2x2xf32>
      %c0_11 = arith.constant 0 : index
      %c0_12 = arith.constant 0 : index
      %15 = vector.load %arg5[%c0_11, %c0_12] : memref<2x2xf32, #tpu.memory_space<vmem>>, vector<2x2xf32>
      tpu.vector_store %arg5[%c0_11, %c0_12], %14 {strides = array<i32>} : memref<2x2xf32, #tpu.memory_space<vmem>>, vector<2x2xf32>,
    } else {
    }
    %3 = arith.index_cast %arg1 : i32 to index
    %c0 = arith.constant 0 : index
    %c0_1 = arith.constant 0 : index
    %4 = vector.load %arg3[%3, %c0, %c0_1] : memref<1x2x8192xf32, #tpu.memory_space<vmem>>, vector<1x2x8192xf32>
    %5 = vector.shape_cast %4 : vector<1x2x8192xf32> to vector<2x8192xf32>
    %c0_2 = arith.constant 0 : index
    %c0_3 = arith.constant 0 : index
    %6 = vector.load %arg5[%c0_2, %c0_3] : memref<2x2xf32, #tpu.memory_space<vmem>>, vector<2x2xf32>
    %c0_4 = arith.constant 0 : index
    %c0_5 = arith.constant 0 : index
    %7 = vector.load %arg2[%c0_4, %c0_5] : memref<2x8192xf32, #tpu.memory_space<vmem>>, vector<2x8192xf32>
    %cst = arith.constant dense<0.000000e+00> : vector<2x2xf32>
    %8 = tpu.matmul %7, %5, %cst {dimension_numbers = #tpu.dot_dimension_numbers<[1], [1], [0], [0], [0, 0, 1, 0], [], []>} : vector<2x8192xf32>, vector<2x8192xf32>, vector<2x2xf32> -> vector<2x2xf32>
    %9 = arith.addf %6, %8 : vector<2x2xf32>
    %c0_6 = arith.constant 0 : index
    %c0_7 = arith.constant 0 : index
    %10 = vector.load %arg5[%c0_6, %c0_7] : memref<2x2xf32, #tpu.memory_space<vmem>>, vector<2x2xf32>
    tpu.vector_store %arg5[%c0_6, %c0_7], %9 {strides = array<i32>} : memref<2x2xf32, #tpu.memory_space<vmem>>, vector<2x2xf32>,
    %c0_i32_8 = arith.constant 0 : i32
    %11 = arith.cmpi eq, %arg1, %c0_i32_8 : i32
    %12 = arith.extui %11 : i1 to i32
    %c0_i32_9 = arith.constant 0 : i32
    %13 = arith.cmpi ne, %12, %c0_i32_9 : i32
    scf.if %13 {
      %c0_10 = arith.constant 0 : index
      %c0_11 = arith.constant 0 : index
      %14 = vector.load %arg5[%c0_10, %c0_11] : memref<2x2xf32, #tpu.memory_space<vmem>>, vector<2x2xf32>
      %c0_12 = arith.constant 0 : index
      %c0_13 = arith.constant 0 : index
      %15 = vector.load %arg4[%c0_12, %c0_13] : memref<2x2xf32, #tpu.memory_space<vmem>>, vector<2x2xf32>
      tpu.vector_store %arg4[%c0_12, %c0_13], %14 {strides = array<i32>} : memref<2x2xf32, #tpu.memory_space<vmem>>, vector<2x2xf32>,
    } else {
    }
    return
  }
  func.func @transform_0(%arg0: i32, %arg1: i32) -> (i32, i32) {
    %c0_i32 = arith.constant 0 : i32
    return %arg0, %arg1 : i32, i32
  }
  func.func @transform_1(%arg0: i32, %arg1: i32) -> (i32, i32, i32) {
    %c0_i32 = arith.constant 0 : i32
    %c0_i32_0 = arith.constant 0 : i32
    %c0_i32_1 = arith.constant 0 : i32
    %c0_i32_2 = arith.constant 0 : i32
    return %c0_i32, %c0_i32_0, %c0_i32_1 : i32, i32, i32
  }
  func.func @transform_2(%arg0: i32, %arg1: i32) -> (i32, i32) {
    %c0_i32 = arith.constant 0 : i32
    %c0_i32_0 = arith.constant 0 : i32
    return %arg0, %c0_i32 : i32, i32
  }
}

</mosaic_0001>

<bundles_post_ra>
// kernel: tpu_custom_call.1
= control target key start
LH: loop header
LB: loop body
LE: loop exit
PB: predicated region body
PF: predicated region fallthrough
CT: control target
= control target key end

     0   :  { %7 = vsyncpa [#allocation4], 0  ;;  %s3280_s0 = inlined_call_operand.hbm [shape: f32[2,8192], index: 0, kind: input, shape index: {}]   ;;  %s3281_s1 = inlined_call_operand.hbm [shape: f32[1,2,8192], index: 1, kind: input, shape index: {}]   ;;  %s3282_s2 = inlined_call_operand.hbm [shape: f32[2,2], index: 2, kind: output, shape index: {}]  }
   0x1   :  { %8 = vsyncpa [#allocation7], 0 }
   0x2   :  { %9 = vsyncpa [#allocation5], 0  ;;  %s3155_s9 = smov [#allocation3]   ;;  %s3156_s11 = smov [#allocation6]  }
   0x3   :  { %s16_s10 = sshll.u32 %s3155_s9, 4  ;;  %s26_s12 = sshll.u32 %s3156_s11, 4  ;;  %s17_s10 = int_to_ptr.vmem [resolvable:$true] %s16_s10  ;;  %s27_s12 = int_to_ptr.vmem [resolvable:$true] %s26_s12 }
   0x4   :  { %s3083_s15 = scalar_lea.hbm %s3280_s0, 2048 }
   0x5   :  { %p3084_p0 = scmp.ne.s32.totalorder %s3280_s0, %s3083_s15  ;;  %p3087_p1 = scmp.lt.u32.totalorder %s3083_s15, %s3280_s0 }
   0x7   :  { %p3089_p2 = pnand %p3087_p1, %p3084_p0 }
   0x9   :  { %3092 = shalt.err (!%p3089_p2)
}
   0xa   :  { %s3093_s20 = scalar_lea.vmem %s17_s10, 2048  ;;  %p3098_p4 = scmp.lt.s32.totalorder %s17_s10, %s17_s10 }
   0xb   :  { %p3094_p3 = scmp.ne.s32.totalorder %s17_s10, %s3093_s20  ;;  %p3099_p5 = scmp.lt.s32.totalorder %s3093_s20, %s3093_s20 }
   0xd   :  { %p3100_p6 = por %p3099_p5, %p3098_p4 }
   0xf   :  { %p3101_p7 = pnand %p3100_p6, %p3094_p3 }
  0x11   :  { %3104 = shalt.err (!%p3101_p7)
}
  0x12   :  { %19 = dma.hbm_to_vmem [thread:$0]  %s3280_s0, 2048, %s17_s10, [#allocation4]  }
  0x13   :  { %s3105_s25 = scalar_lea.hbm %s3281_s1, 2048 }
  0x14   :  { %p3106_p8 = scmp.ne.s32.totalorder %s3281_s1, %s3105_s25  ;;  %p3109_p9 = scmp.lt.u32.totalorder %s3105_s25, %s3281_s1 }
  0x16   :  { %p3111_p10 = pnand %p3109_p9, %p3106_p8 }
  0x18   :  { %3114 = shalt.err (!%p3111_p10)
}
  0x19   :  { %s3115_s30 = scalar_lea.vmem %s27_s12, 2048  ;;  %p3120_p12 = scmp.lt.s32.totalorder %s27_s12, %s27_s12 }
  0x1a   :  { %p3116_p11 = scmp.ne.s32.totalorder %s27_s12, %s3115_s30  ;;  %p3121_p13 = scmp.lt.s32.totalorder %s3115_s30, %s3115_s30 }
  0x1c   :  { %p3122_p0 = por %p3121_p13, %p3120_p12 }
  0x1e   :  { %p3123_p1 = pnand %p3122_p0, %p3116_p11 }
  0x20   :  { %3126 = shalt.err (!%p3123_p1)
}
  0x21   :  { %29 = dma.hbm_to_vmem [thread:$0]  %s3281_s1, 2048, %s27_s12, [#allocation7]  }
  0x22   :  { %3149 = dma.done.wait [#allocation4], 2048  }
  0x23   :  { %3150 = vsyncadd [#allocation4], 4294965248 }
  0x24   :  { %3151 = dma.done.wait [#allocation7], 2048  }
  0x25   :  { %3152 = vsyncadd [#allocation7], 4294965248  ;;  %v98_v0 = vlaneseq  ;;  %v3157_v1 = vmov 1983009808   ;;  %v45_v6 = vld [vmem:[#allocation6] sm:$0xff]  ;;  %v46_v8 = vld [vmem:[#allocation6 + $0x8] sm:$0xff] }
  0x26   :  { %v96_v2 = vunpack.c.l.s4 %v3157_v1  ;;  %v62_v7 = vld [vmem:[#allocation3] sm:$0xff]  ;;  %v446_v10 = vcombine.high %v45_v6, %v45_v6  ;;  %v63_v13 = vld [vmem:[#allocation3 + $0x8] sm:$0xff]  ;;  %v47_v14 = vld [vmem:[#allocation6 + $0x10] sm:$0xff]  ;;  %v463_v16 = vcombine.high %v46_v8, %v46_v8  ;;  %vm40_vm0 = vcmask 9216   ;;  %s3159_s1 = smov [#allocation8]  }
  0x27   :  { %v99_v3 = vshrl.u32 %v98_v0, 7  ;;  %v94_v15 = vcombine.high %v62_v7, %v62_v7  ;;  %v64_v23 = vld [vmem:[#allocation3 + $0x10] sm:$0xff]  ;;  %v48_v24 = vld [vmem:[#allocation6 + $0x18] sm:$0xff]  ;;  %v111_v30 = vcombine.high %v63_v13, %v63_v13  ;;  %v480_v31 = vcombine.high %v47_v14, %v47_v14  ;;  %v49_v42 = vld [vmem:[#allocation6 + $0x20] sm:$0xff]  ;;  %s3036_s4 = sshll.u32 %s3159_s1, 4  ;;  %s3037_s4 = int_to_ptr.vmem [resolvable:$true] %s3036_s4 }
  0x28   :  { %v97_v4 = vunpack.c.0.s8 %v96_v2  ;;  %v128_v38 = vcombine.high %v64_v23, %v64_v23  ;;  %v65_v39 = vld [vmem:[#allocation3 + $0x18] sm:$0xff]  ;;  %v497_v41 = vcombine.high %v48_v24, %v48_v24  ;;  %v514_v51 = vcombine.high %v49_v42, %v49_v42  ;;  %v66_v52 = vld [vmem:[#allocation3 + $0x20] sm:$0xff]  ;;  %v50_v53 = vld [vmem:[#allocation6 + $0x28] sm:$0xff]  ;;  %s3127_s5 = scalar_lea.vmem %s3037_s4, 32  ;;  %p3132_p3 = scmp.lt.s32.totalorder %s3037_s4, %s3037_s4 }
  0x29   :  { %v145_v50 = vcombine.high %v65_v39, %v65_v39  ;;  %v162_v60 = vcombine.high %v66_v52, %v66_v52  ;;  %v531_v61 = vcombine.high %v50_v53, %v50_v53  ;;  %v67_v62 = vld [vmem:[#allocation3 + $0x28] sm:$0xff]  ;;  %v51_v1 = vld [vmem:[#allocation6 + $0x30] sm:$0xff]  ;;  %p3128_p2 = scmp.ne.s32.totalorder %s3037_s4, %s3127_s5  ;;  %p3133_p4 = scmp.lt.s32.totalorder %s3127_s5, %s3127_s5 }
  0x2a   :  { %v3199_v5 = vsub.s32 %v97_v4, %v99_v3 }
  0x2b   :  { %p3134_p5 = por %p3133_p4, %p3132_p3 }
  0x2c   :  { %v453_v9 = vrot.slane %v45_v6, %v3199_v5  ;;  %v101_v11 = vrot.slane %v62_v7, %v3199_v5  ;;  %v470_v12 = vrot.slane %v46_v8, %v3199_v5  ;;  %v118_v17 = vrot.slane %v63_v13, %v3199_v5 }
  0x2d   :  { %v487_v18 = vrot.slane %v47_v14, %v3199_v5  ;;  %v460_v20 = vrot.slane %v446_v10, %v3199_v5  ;;  %v108_v25 = vrot.slane %v94_v15, %v3199_v5  ;;  %v477_v26 = vrot.slane %v463_v16, %v3199_v5  ;;  %p3135_p6 = pnand %p3134_p5, %p3128_p2 }
  0x2e   :  { %v461_v19 = vcombine.high %v453_v9, %v453_v9  ;;  %v109_v21 = vcombine.high %v101_v11, %v101_v11  ;;  %v478_v22 = vcombine.high %v470_v12, %v470_v12  ;;  %v126_v27 = vcombine.high %v118_v17, %v118_v17 }
  0x2f   :  { %v495_v28 = vcombine.high %v487_v18, %v487_v18  ;;  %v462_v29 = vcombine.high %v460_v20, %v460_v20  ;;  %v110_v32 = vcombine.high %v108_v25, %v108_v25  ;;  %v479_v33 = vcombine.high %v477_v26, %v477_v26 }
  0x30   :  { %782 = vmatprep.subr.mxu0 %v461_v19  ;;  %846 = vmatprep.mubr.f32.mxu0 %v109_v21  ;;  %v135_v34 = vrot.slane %v64_v23, %v3199_v5  ;;  %v504_v35 = vrot.slane %v48_v24, %v3199_v5  ;;  %v125_v36 = vrot.slane %v111_v30, %v3199_v5  ;;  %v69_v21 = vld [vmem:[#allocation3 + $0x38] sm:$0xff]  ;;  %v53_v24 = vld [vmem:[#allocation6 + $0x40] sm:$0xff] }
  0x31   :  { %783 = vmatpush1.xpose.msra.mxu0 %v453_v9  ;;  %852 = vmatprep.subr.mxu1 %v462_v29  ;;  %v494_v37 = vrot.slane %v480_v31, %v3199_v5  ;;  %v142_v45 = vrot.slane %v128_v38, %v3199_v5  ;;  %v511_v47 = vrot.slane %v497_v41, %v3199_v5 }
  0x32   :  { %922 = vmatprep.subr.mxu0 %v478_v22  ;;  %853 = vmatpush1.xpose.msra.mxu1 %v460_v20  ;;  %v143_v40 = vcombine.high %v135_v34, %v135_v34  ;;  %v127_v43 = vcombine.high %v125_v36, %v125_v36  ;;  %v512_v46 = vcombine.high %v504_v35, %v504_v35 }
  0x33   :  { %916 = vmatprep.mubr.f32.mxu1 %v110_v32  ;;  %992 = vmatprep.subr.mxu1 %v479_v33  ;;  %v496_v44 = vcombine.high %v494_v37, %v494_v37  ;;  %v152_v48 = vrot.slane %v65_v39, %v3199_v5  ;;  %v521_v49 = vrot.slane %v49_v42, %v3199_v5  ;;  %v70_v33 = vld [vmem:[#allocation3 + $0x40] sm:$0xff] }
  0x34   :  { %847 = vmatmul.mubr.f32.vlgmr.msra.gmra.mrb[0].mxu0 %v101_v11  ;;  %v144_v54 = vcombine.high %v142_v45, %v142_v45  ;;  %v513_v55 = vcombine.high %v511_v47, %v511_v47  ;;  %v159_v57 = vrot.slane %v145_v50, %v3199_v5  ;;  %v528_v58 = vrot.slane %v514_v51, %v3199_v5  ;;  %v68_v11 = vld [vmem:[#allocation3 + $0x30] sm:$0xff] }
  0x35   :  { %923 = vmatpush1.xpose.msra.mxu0 %v470_v12  ;;  %986 = vmatprep.mubr.f32.mxu0 %v126_v27  ;;  %v160_v56 = vcombine.high %v152_v48, %v152_v48  ;;  %v169_v59 = vrot.slane %v66_v52, %v3199_v5  ;;  %v529_v63 = vcombine.high %v521_v49, %v521_v49  ;;  %v52_v12 = vld [vmem:[#allocation6 + $0x38] sm:$0xff] }
  0x36   :  { %917 = vmatmul.mubr.f32.vlgmr.msra.gmra.mrb[0].mxu1 %v108_v25  ;;  %1062 = vmatprep.subr.mxu0 %v495_v28  ;;  %v538_v0 = vrot.slane %v50_v53, %v3199_v5  ;;  %v161_v2 = vcombine.high %v159_v57, %v159_v57  ;;  %v176_v3 = vrot.slane %v162_v60, %v3199_v5  ;;  %v56_v60 = vld [vmem:[#allocation6 + $0x58] sm:$0xff] }
  0x37   :  { %993 = vmatpush1.xpose.msra.mxu1 %v477_v26  ;;  %1056 = vmatprep.mubr.f32.mxu1 %v127_v43  ;;  %v545_v4 = vrot.slane %v531_v61, %v3199_v5  ;;  %v530_v6 = vcombine.high %v528_v58, %v528_v58  ;;  %v179_v7 = vcombine.high %v67_v62, %v67_v62 }
  0x38   :  { %987 = vmatmul.mubr.f32.vlgmr.msra.gmra.mrb[2].mxu0 %v118_v17  ;;  %1132 = vmatprep.subr.mxu1 %v496_v44  ;;  %v177_v8 = vcombine.high %v169_v59, %v169_v59  ;;  %v186_v9 = vrot.slane %v67_v62, %v3199_v5  ;;  %v548_v10 = vcombine.high %v51_v1, %v51_v1 }
  0x39   :  { %1063 = vmatpush1.xpose.msra.mxu0 %v487_v18  ;;  %1126 = vmatprep.mubr.f32.mxu0 %v143_v40  ;;  %v546_v13 = vcombine.high %v538_v0, %v538_v0  ;;  %v555_v14 = vrot.slane %v51_v1, %v3199_v5  ;;  %v178_v15 = vcombine.high %v176_v3, %v176_v3 }
  0x3a   :  { %1057 = vmatmul.mubr.f32.vlgmr.msra.gmra.mrb[2].mxu1 %v125_v36  ;;  %1202 = vmatprep.subr.mxu0 %v512_v46  ;;  %v547_v16 = vcombine.high %v545_v4, %v545_v4  ;;  %v193_v17 = vrot.slane %v179_v7, %v3199_v5  ;;  %v562_v18 = vrot.slane %v548_v10, %v3199_v5  ;;  %v54_v36 = vld [vmem:[#allocation6 + $0x48] sm:$0xff] }
  0x3b   :  { %1133 = vmatpush1.xpose.msra.mxu1 %v494_v37  ;;  %1196 = vmatprep.mubr.f32.mxu1 %v144_v54  ;;  %v196_v19 = vcombine.high %v68_v11, %v68_v11  ;;  %v565_v20 = vcombine.high %v52_v12, %v52_v12  ;;  %v194_v22 = vcombine.high %v186_v9, %v186_v9 }
  0x3c   :  { %1127 = vmatmul.mubr.f32.vlgmr.msra.gmra.mrb[4].mxu0 %v135_v34  ;;  %1272 = vmatprep.subr.mxu1 %v513_v55  ;;  %v203_v23 = vrot.slane %v68_v11, %v3199_v5  ;;  %v563_v25 = vcombine.high %v555_v14, %v555_v14  ;;  %v572_v26 = vrot.slane %v52_v12, %v3199_v5 }
  0x3d   :  { %1203 = vmatpush1.xpose.msra.mxu0 %v504_v35  ;;  %1266 = vmatprep.mubr.f32.mxu0 %v160_v56  ;;  %v195_v27 = vcombine.high %v193_v17, %v193_v17  ;;  %v210_v28 = vrot.slane %v196_v19, %v3199_v5  ;;  %v213_v29 = vcombine.high %v69_v21, %v69_v21 }
  0x3e   :  { %1197 = vmatmul.mubr.f32.vlgmr.msra.gmra.mrb[4].mxu1 %v142_v45  ;;  %1342 = vmatprep.subr.mxu0 %v529_v63  ;;  %v564_v30 = vcombine.high %v562_v18, %v562_v18  ;;  %v579_v31 = vrot.slane %v565_v20, %v3199_v5  ;;  %v582_v32 = vcombine.high %v53_v24, %v53_v24  ;;  %v71_v45 = vld [vmem:[#allocation3 + $0x48] sm:$0xff] }
  0x3f   :  { %1273 = vmatpush1.xpose.msra.mxu1 %v511_v47  ;;  %1336 = vmatprep.mubr.f32.mxu1 %v161_v2  ;;  %v211_v34 = vcombine.high %v203_v23, %v203_v23  ;;  %v220_v35 = vrot.slane %v69_v21, %v3199_v5  ;;  %v580_v37 = vcombine.high %v572_v26, %v572_v26  ;;  %v58_v21 = vld [vmem:[#allocation6 + $0x68] sm:$0xff] }
  0x40   :  { %1267 = vmatmul.mubr.f32.vlgmr.msra.gmra.mrb[6].mxu0 %v152_v48  ;;  %1412 = vmatprep.subr.mxu1 %v530_v6  ;;  %v589_v38 = vrot.slane %v53_v24, %v3199_v5  ;;  %v212_v39 = vcombine.high %v210_v28, %v210_v28  ;;  %v227_v40 = vrot.slane %v213_v29, %v3199_v5  ;;  %v55_v48 = vld [vmem:[#allocation6 + $0x50] sm:$0xff]  ;;  %v73_v6 = vld [vmem:[#allocation3 + $0x58] sm:$0xff] }
  0x41   :  { %1343 = vmatpush1.xpose.msra.mxu0 %v521_v49  ;;  %1406 = vmatprep.mubr.f32.mxu0 %v177_v8  ;;  %v230_v41 = vcombine.high %v70_v33, %v70_v33  ;;  %v581_v42 = vcombine.high %v579_v31, %v579_v31  ;;  %v596_v43 = vrot.slane %v582_v32, %v3199_v5 }
  0x42   :  { %1337 = vmatmul.mubr.f32.vlgmr.msra.gmra.mrb[6].mxu1 %v159_v57  ;;  %1482 = vmatprep.subr.mxu0 %v546_v13  ;;  %v599_v44 = vcombine.high %v54_v36, %v54_v36  ;;  %v228_v46 = vcombine.high %v220_v35, %v220_v35  ;;  %v237_v47 = vrot.slane %v70_v33, %v3199_v5  ;;  %v72_v57 = vld [vmem:[#allocation3 + $0x50] sm:$0xff] }
  0x43   :  { %1413 = vmatpush1.xpose.msra.mxu1 %v528_v58  ;;  %1476 = vmatprep.mubr.f32.mxu1 %v178_v15  ;;  %v597_v49 = vcombine.high %v589_v38, %v589_v38  ;;  %v606_v50 = vrot.slane %v54_v36, %v3199_v5  ;;  %v229_v51 = vcombine.high %v227_v40, %v227_v40  ;;  %v59_v33 = vld [vmem:[#allocation6 + $0x70] sm:$0xff] }
  0x44   :  { %1407 = vmatmul.mubr.f32.vlgmr.msra.gmra.mrb[8].mxu0 %v169_v59  ;;  %1552 = vmatprep.subr.mxu1 %v547_v16  ;;  %v244_v52 = vrot.slane %v230_v41, %v3199_v5  ;;  %v247_v53 = vcombine.high %v71_v45, %v71_v45  ;;  %v598_v54 = vcombine.high %v596_v43, %v596_v43 }
  0x45   :  { %1483 = vmatpush1.xpose.msra.mxu0 %v538_v0  ;;  %1546 = vmatprep.mubr.f32.mxu0 %v194_v22  ;;  %v613_v55 = vrot.slane %v599_v44, %v3199_v5  ;;  %v616_v56 = vcombine.high %v55_v48, %v55_v48  ;;  %v245_v58 = vcombine.high %v237_v47, %v237_v47 }
  0x46   :  { %1477 = vmatmul.mubr.f32.vlgmr.msra.gmra.mrb[8].mxu1 %v176_v3  ;;  %1622 = vmatprep.subr.mxu0 %v563_v25  ;;  %v254_v59 = vrot.slane %v71_v45, %v3199_v5  ;;  %v614_v61 = vcombine.high %v606_v50, %v606_v50  ;;  %v623_v62 = vrot.slane %v55_v48, %v3199_v5  ;;  %v60_v45 = vld [vmem:[#allocation6 + $0x78] sm:$0xff] }
  0x47   :  { %1553 = vmatpush1.xpose.msra.mxu1 %v545_v4  ;;  %1616 = vmatprep.mubr.f32.mxu1 %v195_v27  ;;  %v246_v63 = vcombine.high %v244_v52, %v244_v52  ;;  %v261_v0 = vrot.slane %v247_v53, %v3199_v5  ;;  %v264_v1 = vcombine.high %v72_v57, %v72_v57 }
  0x48   :  { %1547 = vmatmul.mubr.f32.vlgmr.msra.gmra.mrb[10].mxu0 %v186_v9  ;;  %1692 = vmatprep.subr.mxu1 %v564_v30  ;;  %v615_v2 = vcombine.high %v613_v55, %v613_v55  ;;  %v630_v3 = vrot.slane %v616_v56, %v3199_v5  ;;  %v633_v4 = vcombine.high %v56_v60, %v56_v60  ;;  %v57_v9 = vld [vmem:[#allocation6 + $0x60] sm:$0xff]  ;;  %v75_v30 = vld [vmem:[#allocation3 + $0x68] sm:$0xff] }
  0x49   :  { %1623 = vmatpush1.xpose.msra.mxu0 %v555_v14  ;;  %1686 = vmatprep.mubr.f32.mxu0 %v211_v34  ;;  %v262_v7 = vcombine.high %v254_v59, %v254_v59  ;;  %v271_v8 = vrot.slane %v72_v57, %v3199_v5  ;;  %v631_v10 = vcombine.high %v623_v62, %v623_v62 }
  0x4a   :  { %1617 = vmatmul.mubr.f32.vlgmr.msra.gmra.mrb[10].mxu1 %v193_v17  ;;  %1762 = vmatprep.subr.mxu0 %v580_v37  ;;  %v640_v11 = vrot.slane %v56_v60, %v3199_v5  ;;  %v263_v12 = vcombine.high %v261_v0, %v261_v0  ;;  %v278_v13 = vrot.slane %v264_v1, %v3199_v5 }
  0x4b   :  { %1693 = vmatpush1.xpose.msra.mxu1 %v562_v18  ;;  %1756 = vmatprep.mubr.f32.mxu1 %v212_v39  ;;  %v281_v14 = vcombine.high %v73_v6, %v73_v6  ;;  %v632_v15 = vcombine.high %v630_v3, %v630_v3  ;;  %v647_v16 = vrot.slane %v633_v4, %v3199_v5  ;;  %v74_v18 = vld [vmem:[#allocation3 + $0x60] sm:$0xff] }
  0x4c   :  { %1687 = vmatmul.mubr.f32.vlgmr.msra.gmra.mrb[12].mxu0 %v203_v23  ;;  %1832 = vmatprep.subr.mxu1 %v581_v42  ;;  %v650_v17 = vcombine.high %v57_v9, %v57_v9  ;;  %v279_v19 = vcombine.high %v271_v8, %v271_v8  ;;  %v288_v20 = vrot.slane %v73_v6, %v3199_v5  ;;  %v76_v42 = vld [vmem:[#allocation3 + $0x70] sm:$0xff] }
  0x4d   :  { %1763 = vmatpush1.xpose.msra.mxu0 %v572_v26  ;;  %1826 = vmatprep.mubr.f32.mxu0 %v228_v46  ;;  %v648_v22 = vcombine.high %v640_v11, %v640_v11  ;;  %v657_v23 = vrot.slane %v57_v9, %v3199_v5  ;;  %v280_v24 = vcombine.high %v278_v13, %v278_v13 }
  0x4e   :  { %1757 = vmatmul.mubr.f32.vlgmr.msra.gmra.mrb[12].mxu1 %v210_v28  ;;  %1902 = vmatprep.subr.mxu0 %v597_v49  ;;  %v295_v25 = vrot.slane %v281_v14, %v3199_v5  ;;  %v298_v26 = vcombine.high %v74_v18, %v74_v18  ;;  %v649_v27 = vcombine.high %v647_v16, %v647_v16 }
  0x4f   :  { %1833 = vmatpush1.xpose.msra.mxu1 %v579_v31  ;;  %1896 = vmatprep.mubr.f32.mxu1 %v229_v51  ;;  %v664_v28 = vrot.slane %v650_v17, %v3199_v5  ;;  %v667_v29 = vcombine.high %v58_v21, %v58_v21  ;;  %v296_v31 = vcombine.high %v288_v20, %v288_v20 }
  0x50   :  { %1827 = vmatmul.mubr.f32.vlgmr.msra.gmra.mrb[14].mxu0 %v220_v35  ;;  %1972 = vmatprep.subr.mxu1 %v598_v54  ;;  %v305_v32 = vrot.slane %v74_v18, %v3199_v5  ;;  %v665_v34 = vcombine.high %v657_v23, %v657_v23  ;;  %v674_v35 = vrot.slane %v58_v21, %v3199_v5  ;;  %v77_v54 = vld [vmem:[#allocation3 + $0x78] sm:$0xff] }
  0x51   :  { %1903 = vmatpush1.xpose.msra.mxu0 %v589_v38  ;;  %1966 = vmatprep.mubr.f32.mxu0 %v245_v58  ;;  %v297_v36 = vcombine.high %v295_v25, %v295_v25  ;;  %v312_v37 = vrot.slane %v298_v26, %v3199_v5  ;;  %v315_v38 = vcombine.high %v75_v30, %v75_v30 }
  0x52   :  { %1897 = vmatmul.mubr.f32.vlgmr.msra.gmra.mrb[14].mxu1 %v227_v40  ;;  %2042 = vmatprep.subr.mxu0 %v614_v61  ;;  %v666_v39 = vcombine.high %v664_v28, %v664_v28  ;;  %v681_v40 = vrot.slane %v667_v29, %v3199_v5  ;;  %v684_v41 = vcombine.high %v59_v33, %v59_v33 }
  0x53   :  { %1973 = vmatpush1.xpose.msra.mxu1 %v596_v43  ;;  %2036 = vmatprep.mubr.f32.mxu1 %v246_v63  ;;  %v313_v43 = vcombine.high %v305_v32, %v305_v32  ;;  %v322_v44 = vrot.slane %v75_v30, %v3199_v5  ;;  %v682_v46 = vcombine.high %v674_v35, %v674_v35 }
  0x54   :  { %1967 = vmatmul.mubr.f32.vlgmr.msra.gmra.mrb[16].mxu0 %v237_v47  ;;  %2112 = vmatprep.subr.mxu1 %v615_v2  ;;  %v691_v47 = vrot.slane %v59_v33, %v3199_v5  ;;  %v314_v48 = vcombine.high %v312_v37, %v312_v37  ;;  %v329_v49 = vrot.slane %v315_v38, %v3199_v5 }
  0x55   :  { %2043 = vmatpush1.xpose.msra.mxu0 %v606_v50  ;;  %2106 = vmatprep.mubr.f32.mxu0 %v262_v7  ;;  %v332_v50 = vcombine.high %v76_v42, %v76_v42  ;;  %v683_v51 = vcombine.high %v681_v40, %v681_v40  ;;  %v701_v53 = vcombine.high %v60_v45, %v60_v45 }
  0x56   :  { %2037 = vmatmul.mubr.f32.vlgmr.msra.gmra.mrb[16].mxu1 %v244_v52  ;;  %2182 = vmatprep.subr.mxu0 %v631_v10  ;;  %v698_v52 = vrot.slane %v684_v41, %v3199_v5  ;;  %v339_v56 = vrot.slane %v76_v42, %v3199_v5  ;;  %v699_v57 = vcombine.high %v691_v47, %v691_v47 }
  0x57   :  { %2113 = vmatpush1.xpose.msra.mxu1 %v613_v55  ;;  %2176 = vmatprep.mubr.f32.mxu1 %v263_v12  ;;  %v330_v55 = vcombine.high %v322_v44, %v322_v44  ;;  %v708_v58 = vrot.slane %v60_v45, %v3199_v5  ;;  %v346_v60 = vrot.slane %v332_v50, %v3199_v5 }
  0x58   :  { %2107 = vmatmul.mubr.f32.vlgmr.msra.gmra.mrb[18].mxu0 %v254_v59  ;;  %2252 = vmatprep.subr.mxu1 %v632_v15  ;;  %v331_v59 = vcombine.high %v329_v49, %v329_v49  ;;  %v349_v61 = vcombine.high %v77_v54, %v77_v54  ;;  %v715_v63 = vrot.slane %v701_v53, %v3199_v5 }
  0x59   :  { %2183 = vmatpush1.xpose.msra.mxu0 %v623_v62  ;;  %2246 = vmatprep.mubr.f32.mxu0 %v279_v19  ;;  %v700_v62 = vcombine.high %v698_v52, %v698_v52  ;;  %v356_v1 = vrot.slane %v77_v54, %v3199_v5  ;;  %v716_v2 = vcombine.high %v708_v58, %v708_v58 }
  0x5a   :  { %2177 = vmatmul.mubr.f32.vlgmr.msra.gmra.mrb[18].mxu1 %v261_v0  ;;  %2322 = vmatprep.subr.mxu0 %v648_v22  ;;  %v347_v0 = vcombine.high %v339_v56, %v339_v56  ;;  %v363_v4 = vrot.slane %v349_v61, %v3199_v5  ;;  %v717_v6 = vcombine.high %v715_v63, %v715_v63  ;;  %v3158_v5 = vmov 0.0  }
  0x5b   :  { %2253 = vmatpush1.xpose.msra.mxu1 %v630_v3  ;;  %2316 = vmatprep.mubr.f32.mxu1 %v280_v24  ;;  %v348_v3 = vcombine.high %v346_v60, %v346_v60  ;;  %v364_v7 = vcombine.high %v356_v1, %v356_v1  ;;  %41 = vst.msk [vmem:[#allocation2] sm:$0x3] %vm40_vm0, %v3158_v5 }
  0x5c   :  { %2247 = vmatmul.mubr.f32.vlgmr.msra.gmra.mrb[20].mxu0 %v271_v8  ;;  %2392 = vmatprep.subr.mxu1 %v649_v27  ;;  %v365_v8 = vcombine.high %v363_v4, %v363_v4 }
  0x5d   :  { %2323 = vmatpush1.xpose.msra.mxu0 %v640_v11  ;;  %2386 = vmatprep.mubr.f32.mxu0 %v296_v31 }
  0x5e   :  { %2317 = vmatmul.mubr.f32.vlgmr.msra.gmra.mrb[20].mxu1 %v278_v13  ;;  %2462 = vmatprep.subr.mxu0 %v665_v34 }
  0x5f   :  { %2393 = vmatpush1.xpose.msra.mxu1 %v647_v16  ;;  %2456 = vmatprep.mubr.f32.mxu1 %v297_v36 }
  0x60   :  { %2387 = vmatmul.mubr.f32.vlgmr.msra.gmra.mrb[22].mxu0 %v288_v20  ;;  %2532 = vmatprep.subr.mxu1 %v666_v39 }
  0x61   :  { %2463 = vmatpush1.xpose.msra.mxu0 %v657_v23  ;;  %2526 = vmatprep.mubr.f32.mxu0 %v313_v43 }
  0x62   :  { %2457 = vmatmul.mubr.f32.vlgmr.msra.gmra.mrb[22].mxu1 %v295_v25  ;;  %2602 = vmatprep.subr.mxu0 %v682_v46 }
  0x63   :  { %2533 = vmatpush1.xpose.msra.mxu1 %v664_v28  ;;  %2596 = vmatprep.mubr.f32.mxu1 %v314_v48 }
  0x64   :  { %2527 = vmatmul.mubr.f32.vlgmr.msra.gmra.mrb[24].mxu0 %v305_v32  ;;  %2672 = vmatprep.subr.mxu1 %v683_v51 }
  0x65   :  { %2603 = vmatpush1.xpose.msra.mxu0 %v674_v35  ;;  %2666 = vmatprep.mubr.f32.mxu0 %v330_v55 }
  0x66   :  { %2597 = vmatmul.mubr.f32.vlgmr.msra.gmra.mrb[24].mxu1 %v312_v37  ;;  %2742 = vmatprep.subr.mxu0 %v699_v57 }
  0x67   :  { %2673 = vmatpush1.xpose.msra.mxu1 %v681_v40  ;;  %2736 = vmatprep.mubr.f32.mxu1 %v331_v59 }
  0x68   :  { %2667 = vmatmul.mubr.f32.vlgmr.msra.gmra.mrb[26].mxu0 %v322_v44  ;;  %2812 = vmatprep.subr.mxu1 %v700_v62 }
  0x69   :  { %2743 = vmatpush1.xpose.msra.mxu0 %v691_v47  ;;  %2806 = vmatprep.mubr.f32.mxu0 %v347_v0 }
  0x6a   :  { %2737 = vmatmul.mubr.f32.vlgmr.msra.gmra.mrb[26].mxu1 %v329_v49  ;;  %2882 = vmatprep.subr.mxu0 %v716_v2 }
  0x6b   :  { %2813 = vmatpush1.xpose.msra.mxu1 %v698_v52  ;;  %2876 = vmatprep.mubr.f32.mxu1 %v348_v3 }
  0x6c   :  { %2807 = vmatmul.mubr.f32.vlgmr.msra.gmra.mrb[28].mxu0 %v339_v56  ;;  %2952 = vmatprep.subr.mxu1 %v717_v6 }
  0x6d   :  { %2883 = vmatpush1.xpose.msra.mxu0 %v708_v58  ;;  %2946 = vmatprep.mubr.f32.mxu0 %v364_v7 }
  0x6e   :  { %2877 = vmatmul.mubr.f32.vlgmr.msra.gmra.mrb[28].mxu1 %v346_v60 }
  0x6f   :  { %2953 = vmatpush1.xpose.msra.mxu1 %v715_v63  ;;  %3016 = vmatprep.mubr.f32.mxu1 %v365_v8 }
  0x70   :  { %2947 = vmatmul.mubr.f32.vlgmr.msra.gmra.mrb[30].mxu0 %v356_v1 }
  0x72   :  { %3017 = vmatmul.mubr.f32.vlgmr.msra.gmra.mrb[30].mxu1 %v363_v4 }
 0x107   :  { %v848_v9 = vpop.f32.mrb[0].mxu0 }
 0x108   :  { %v850_v10 = vpop.f32.mrb[1].mxu0 }
 0x109   :  { %v918_v11 = vpop.f32.mrb[0].mxu1 }
 0x10a   :  { %v919_v12 = vadd.f32 %v918_v11, %v848_v9  ;;  %v920_v13 = vpop.f32.mrb[1].mxu1 }
 0x10b   :  { %v988_v14 = vpop.f32.mrb[2].mxu0 }
 0x10c   :  { %v989_v15 = vadd.f32 %v988_v14, %v919_v12  ;;  %v990_v16 = vpop.f32.mrb[3].mxu0 }
 0x10d   :  { %v1058_v17 = vpop.f32.mrb[2].mxu1 }
 0x10e   :  { %v1059_v18 = vadd.f32 %v1058_v17, %v989_v15  ;;  %v1060_v19 = vpop.f32.mrb[3].mxu1 }
 0x10f   :  { %v1128_v20 = vpop.f32.mrb[4].mxu0 }
 0x110   :  { %v1129_v21 = vadd.f32 %v1128_v20, %v1059_v18  ;;  %v1130_v22 = vpop.f32.mrb[5].mxu0 }
 0x111   :  { %v1198_v23 = vpop.f32.mrb[4].mxu1 }
 0x112   :  { %v1199_v24 = vadd.f32 %v1198_v23, %v1129_v21  ;;  %v1200_v25 = vpop.f32.mrb[5].mxu1 }
 0x113   :  { %v1268_v26 = vpop.f32.mrb[6].mxu0 }
 0x114   :  { %v1269_v27 = vadd.f32 %v1268_v26, %v1199_v24  ;;  %v1270_v28 = vpop.f32.mrb[7].mxu0 }
 0x115   :  { %v1338_v29 = vpop.f32.mrb[6].mxu1 }
 0x116   :  { %v1339_v30 = vadd.f32 %v1338_v29, %v1269_v27  ;;  %v1340_v31 = vpop.f32.mrb[7].mxu1 }
 0x117   :  { %v1408_v32 = vpop.f32.mrb[8].mxu0 }
 0x118   :  { %v1409_v33 = vadd.f32 %v1408_v32, %v1339_v30  ;;  %v1410_v34 = vpop.f32.mrb[9].mxu0 }
 0x119   :  { %v1478_v35 = vpop.f32.mrb[8].mxu1 }
 0x11a   :  { %v1479_v36 = vadd.f32 %v1478_v35, %v1409_v33  ;;  %v1480_v37 = vpop.f32.mrb[9].mxu1 }
 0x11b   :  { %v1548_v38 = vpop.f32.mrb[10].mxu0  ;;  %v61_v37 = vld [vmem:[#allocation2] sm:$0x3] }
 0x11c   :  { %v1549_v39 = vadd.f32 %v1548_v38, %v1479_v36  ;;  %v1550_v40 = vpop.f32.mrb[11].mxu0 }
 0x11d   :  { %v1618_v41 = vpop.f32.mrb[10].mxu1 }
 0x11e   :  { %v1619_v42 = vadd.f32 %v1618_v41, %v1549_v39  ;;  %v1620_v43 = vpop.f32.mrb[11].mxu1 }
 0x11f   :  { %v1688_v44 = vpop.f32.mrb[12].mxu0 }
 0x120   :  { %v1689_v45 = vadd.f32 %v1688_v44, %v1619_v42  ;;  %v1690_v46 = vpop.f32.mrb[13].mxu0 }
 0x121   :  { %v1758_v47 = vpop.f32.mrb[12].mxu1 }
 0x122   :  { %v1759_v48 = vadd.f32 %v1758_v47, %v1689_v45  ;;  %v1760_v49 = vpop.f32.mrb[13].mxu1 }
 0x123   :  { %v1828_v50 = vpop.f32.mrb[14].mxu0 }
 0x124   :  { %v1829_v51 = vadd.f32 %v1828_v50, %v1759_v48  ;;  %v1830_v52 = vpop.f32.mrb[15].mxu0 }
 0x125   :  { %v1898_v53 = vpop.f32.mrb[14].mxu1 }
 0x126   :  { %v1899_v54 = vadd.f32 %v1898_v53, %v1829_v51  ;;  %v1900_v55 = vpop.f32.mrb[15].mxu1 }
 0x127   :  { %v1968_v56 = vpop.f32.mrb[16].mxu0 }
 0x128   :  { %v1969_v57 = vadd.f32 %v1968_v56, %v1899_v54  ;;  %v1970_v58 = vpop.f32.mrb[17].mxu0 }
 0x129   :  { %v2038_v59 = vpop.f32.mrb[16].mxu1 }
 0x12a   :  { %v2039_v60 = vadd.f32 %v2038_v59, %v1969_v57  ;;  %v2040_v61 = vpop.f32.mrb[17].mxu1 }
 0x12b   :  { %v2108_v62 = vpop.f32.mrb[18].mxu0 }
 0x12c   :  { %v2109_v63 = vadd.f32 %v2108_v62, %v2039_v60  ;;  %v2110_v0 = vpop.f32.mrb[19].mxu0 }
 0x12d   :  { %v2178_v1 = vpop.f32.mrb[18].mxu1 }
 0x12e   :  { %v2179_v2 = vadd.f32 %v2178_v1, %v2109_v63  ;;  %v2180_v3 = vpop.f32.mrb[19].mxu1 }
 0x12f   :  { %v2248_v4 = vpop.f32.mrb[20].mxu0 }
 0x130   :  { %v2249_v6 = vadd.f32 %v2248_v4, %v2179_v2  ;;  %v2250_v7 = vpop.f32.mrb[21].mxu0 }
 0x131   :  { %v2318_v8 = vpop.f32.mrb[20].mxu1 }
 0x132   :  { %v2319_v5 = vadd.f32 %v2318_v8, %v2249_v6  ;;  %v2320_v9 = vpop.f32.mrb[21].mxu1 }
 0x133   :  { %v2388_v10 = vpop.f32.mrb[22].mxu0 }
 0x134   :  { %v2389_v11 = vadd.f32 %v2388_v10, %v2319_v5  ;;  %v2390_v12 = vpop.f32.mrb[23].mxu0 }
 0x135   :  { %v2458_v13 = vpop.f32.mrb[22].mxu1 }
 0x136   :  { %v2459_v14 = vadd.f32 %v2458_v13, %v2389_v11  ;;  %v2460_v15 = vpop.f32.mrb[23].mxu1 }
 0x137   :  { %v2528_v16 = vpop.f32.mrb[24].mxu0 }
 0x138   :  { %v2529_v17 = vadd.f32 %v2528_v16, %v2459_v14  ;;  %v2530_v18 = vpop.f32.mrb[25].mxu0 }
 0x139   :  { %v2598_v19 = vpop.f32.mrb[24].mxu1 }
 0x13a   :  { %v2599_v20 = vadd.f32 %v2598_v19, %v2529_v17  ;;  %v2600_v21 = vpop.f32.mrb[25].mxu1 }
 0x13b   :  { %v2668_v22 = vpop.f32.mrb[26].mxu0 }
 0x13c   :  { %v2669_v23 = vadd.f32 %v2668_v22, %v2599_v20  ;;  %v2670_v24 = vpop.f32.mrb[27].mxu0 }
 0x13d   :  { %v2738_v25 = vpop.f32.mrb[26].mxu1 }
 0x13e   :  { %v2739_v26 = vadd.f32 %v2738_v25, %v2669_v23  ;;  %v2740_v27 = vpop.f32.mrb[27].mxu1 }
 0x13f   :  { %v2808_v28 = vpop.f32.mrb[28].mxu0 }
 0x140   :  { %v2809_v29 = vadd.f32 %v2808_v28, %v2739_v26  ;;  %v2810_v30 = vpop.f32.mrb[29].mxu0 }
 0x141   :  { %v2878_v31 = vpop.f32.mrb[28].mxu1 }
 0x142   :  { %v2879_v32 = vadd.f32 %v2878_v31, %v2809_v29  ;;  %v2880_v33 = vpop.f32.mrb[29].mxu1 }
 0x143   :  { %v2948_v34 = vpop.f32.mrb[30].mxu0 }
 0x144   :  { %v2949_v35 = vadd.f32 %v2948_v34, %v2879_v32  ;;  %v2950_v36 = vpop.f32.mrb[31].mxu0 }
 0x145   :  { %v3018_v38 = vpop.f32.mrb[30].mxu1 }
 0x146   :  { %v3019_v39 = vadd.f32 %v3018_v38, %v2949_v35  ;;  %v3020_v40 = vpop.f32.mrb[31].mxu1 }
 0x148   :  { %v3022_v41 = vadd.f32 %v3019_v39, %v61_v37 }
 0x14a   :  { %3024 = vst.msk [vmem:[#allocation2] sm:$0x3] %vm40_vm0, %v3022_v41 }
 0x151   :  { %v3028_v42 = vld [vmem:[#allocation2] sm:$0x3] }
 0x152   :  { %3029 = vst.msk [vmem:[#allocation8] sm:$0x3] %vm40_vm0, %v3028_v42 }
 0x153   :  { %3138 = shalt.err (!%p3135_p6)
}
 0x154   :  { %s3139_s8 = scalar_lea.hbm %s3282_s2, 32 }
 0x155   :  { %p3140_p7 = scmp.ne.s32.totalorder %s3282_s2, %s3139_s8  ;;  %p3143_p8 = scmp.lt.u32.totalorder %s3139_s8, %s3282_s2 }
 0x157   :  { %p3145_p9 = pnand %p3143_p8, %p3140_p7 }
 0x159   :  { %3148 = shalt.err (!%p3145_p9)
}
 0x15a   :  { %3039 = dma.vmem_to_hbm [thread:$0]  %s3037_s4, 32, %s3282_s2, [#allocation5]  }
 0x15b   :  { %3153 = dma.done.wait [#allocation5], 32  }
 0x15c   :  { %3154 = vsyncadd [#allocation5], 4294967264 }
 0x15d   :  { %3043 = vsyncpa [#allocation4], 1 }
 0x15e   :  { %3044 = vsyncpa [#allocation7], 1 }
 0x15f   :  { %3045 = vsyncpa [#allocation5], 1 }

</bundles_post_ra>
